<compile_context>
chip_gen: v5e
topology: v5e:2x2
jax: 0.10.0
libtpu: 0.0.40
codegen_flags: <defaults>
</compile_context>

<pallas_src>
import jax
import jax.numpy as jnp
from jax.experimental import pallas as pl
from jax.experimental.pallas import tpu as pltpu


def _round_up(n, m):
    return ((n + m - 1) // m) * m


def _decision_kernel(x_ref, wt_ref, b_ref, o_ref):
    """One batch tile: o[(C, TB)] = softmax_over_C( W^T @ x_tile^T + b )."""
    x = x_ref[...]                        # (TB, D) activation tile
    wt = wt_ref[...]                      # (C, D)  transposed weights (tiny, resident)
    C = wt_ref.shape[0]

    # logits_t: (C, TB).  Contract the feature dim of both operands so the MXU
    # computes W^T @ x^T without materializing a transpose of the x tile.
    logits_t = jax.lax.dot_general(
        wt, x,
        dimension_numbers=(((1,), (1,)), ((), ())),
        preferred_element_type=jnp.float32,
    )

    # Unrolled softmax over the (small, static) class axis: classes sit on
    # sublanes, so everything below is VPU max/add/sub + EUP exp — no XLU
    # cross-lane reductions, and the stores are lane-dense (TB lanes).
    rows = [logits_t[c:c + 1, :] + b_ref[c] for c in range(C)]   # each (1, TB)
    m = rows[0]
    for r in rows[1:]:
        m = jnp.maximum(m, r)
    exps = [jnp.exp(r - m) for r in rows]
    denom = exps[0]
    for e in exps[1:]:
        denom = denom + e
    inv = 1.0 / denom                      # exact reciprocal: rows sum to 1 (f32)
    for c in range(C):
        o_ref[c:c + 1, :] = (exps[c] * inv).astype(o_ref.dtype)


def decision_branch(x, w, b, *, block_b=8192):
    """softmax(x @ w + b) over classes. x: (B, D), w: (D, C), b: (C,) -> (B, C)."""
    B, D = x.shape
    Dw, C = w.shape
    assert Dw == D and b.shape == (C,)

    # --- Batch tile selection (kernel is HBM-bandwidth bound) ---------------
    # Big tiles amortize the ~0.35 us/grid-step overhead; clamp so large
    # batches still produce >= 8 grid steps (megacore + pipelining), with a
    # 1024-row floor so tiles never shrink below ~0.5 MiB.
    TB = min(int(block_b), _round_up(B, 128))
    while TB > 1024 and pl.cdiv(B, TB) < 8:
        TB //= 2
    TB = max(TB, 128)

    grid_b = pl.cdiv(B, TB)
    B_pad = grid_b * TB
    if B_pad != B:
        # Pad the tail instead of compiling one giant unaligned block; padded
        # rows compute a harmless softmax(bias) and are sliced off below.
        x = jnp.pad(x, ((0, B_pad - B), (0, 0)))

    wt = jnp.transpose(w).astype(x.dtype)     # (C, D), tiny
    b = b.astype(jnp.float32)

    itemsize = jnp.dtype(x.dtype).itemsize
    cost = pl.CostEstimate(
        flops=2 * B * D * C,
        transcendentals=B * C,
        bytes_accessed=B * D * itemsize + B * C * 4 + C * D * itemsize,
    )

    out_t = pl.pallas_call(
        _decision_kernel,
        out_shape=jax.ShapeDtypeStruct((C, B_pad), jnp.float32),
        grid=(grid_b,),
        in_specs=[
            pl.BlockSpec((TB, D), lambda i: (i, 0)),               # x batch tile
            pl.BlockSpec((C, D), lambda i: (0, 0)),                # W^T, constant block
            pl.BlockSpec(memory_space=pltpu.MemorySpace.SMEM),     # bias scalars
        ],
        out_specs=pl.BlockSpec((C, TB), lambda i: (0, i)),         # lane-dense stores
        compiler_params=pltpu.CompilerParams(
            dimension_semantics=("parallel",),
        ),
        cost_estimate=cost,
    )(x, wt, b)

    # One cheap (3, B) -> (B, 3) pass to match the PyTorch module's layout.
    return out_t[:, :B].T


def _reference(x, w, b):
    logits = x @ w + b
    logits = logits - jnp.max(logits, axis=-1, keepdims=True)
    e = jnp.exp(logits)
    return e / jnp.sum(e, axis=-1, keepdims=True)


if __name__ == "__main__":
    key = jax.random.PRNGKey(0)
    kx, kw, kb = jax.random.split(key, 3)

    D, C = 128, 3                         # nn.Linear(128, 3) from the module
    bound = 1.0 / (D ** 0.5)              # PyTorch-style uniform init scale
    w = jax.random.uniform(kw, (D, C), jnp.float32, -bound, bound)
    b = jax.random.uniform(kb, (C,), jnp.float32, -bound, bound)

    # Case 1 (1024 rows, forced 256-row tiles): multi-tile pipelined/parallel path.
    # Case 2 (10 rows, default tile): unaligned-batch padding path.
    for batch, blk in ((1024, 256), (10, 8192)):
        x = jax.random.normal(jax.random.fold_in(kx, batch), (batch, D), jnp.float32)
        out = jax.block_until_ready(decision_branch(x, w, b, block_b=blk))
        ref = _reference(x, w, b)
        assert out.shape == (batch, C)
        # atol covers XLA's default reduced-precision (bf16-class) matmul in the
        # reference vs. the kernel's f32-accumulated MXU matmul.
        assert jnp.allclose(out, ref, atol=5e-3, rtol=1e-3), "mismatch vs reference"
        # Exact normalization inside the kernel -> rows sum to 1 to f32 rounding.
        assert jnp.allclose(jnp.sum(out, axis=-1), 1.0, atol=1e-4), "rows must sum to 1"

    print("KERNEL_OK")
</pallas_src>

<mosaic_0001>
module attributes {stable_mosaic.version = 11 : i64} {
  func.func @_decision_kernel(%arg0: i32, %arg1: memref<256x128xf32, #tpu.memory_space<vmem>>, %arg2: memref<3x128xf32, #tpu.memory_space<vmem>>, %arg3: memref<3xf32, #tpu.memory_space<smem>>, %arg4: memref<3x256xf32, #tpu.memory_space<vmem>>) attributes {dimension_semantics = [#tpu.dimension_semantics<parallel>], iteration_bounds = array<i64: 4>, scalar_prefetch = 0 : i64, scratch_operands = 0 : i64, tpu.core_type = #tpu.core_type<tc>, window_params = [{transform_indices = @transform_0, window_bounds = array<i64: 256, 128>}, {pipeline_mode = #tpu.pipeline_mode<synchronous>, transform_indices = @transform_1, window_bounds = array<i64: 3, 128>}, {transform_indices = @transform_2, window_bounds = array<i64: 3>}, {transform_indices = @transform_3, window_bounds = array<i64: 3, 256>}]} {
    %c0 = arith.constant 0 : index
    %c0_0 = arith.constant 0 : index
    %0 = vector.load %arg1[%c0, %c0_0] : memref<256x128xf32, #tpu.memory_space<vmem>>, vector<256x128xf32>
    %c0_1 = arith.constant 0 : index
    %c0_2 = arith.constant 0 : index
    %1 = vector.load %arg2[%c0_1, %c0_2] : memref<3x128xf32, #tpu.memory_space<vmem>>, vector<3x128xf32>
    %cst = arith.constant dense<0.000000e+00> : vector<3x256xf32>
    %2 = tpu.matmul %1, %0, %cst {dimension_numbers = #tpu.dot_dimension_numbers<[1], [1], [0], [0], [0, 0, 1, 0], [], []>} : vector<3x128xf32>, vector<256x128xf32>, vector<3x256xf32> -> vector<3x256xf32>
    %3 = vector.extract_strided_slice %2 {offsets = [0, 0], sizes = [1, 256], strides = [1, 1]} : vector<3x256xf32> to vector<1x256xf32>
    %c0_3 = arith.constant 0 : index
    %4 = memref.load %arg3[%c0_3] : memref<3xf32, #tpu.memory_space<smem>>
    %5 = vector.broadcast %4 : f32 to vector<1x256xf32>
    %6 = arith.addf %3, %5 : vector<1x256xf32>
    %7 = vector.extract_strided_slice %2 {offsets = [1, 0], sizes = [1, 256], strides = [1, 1]} : vector<3x256xf32> to vector<1x256xf32>
    %c1 = arith.constant 1 : index
    %8 = memref.load %arg3[%c1] : memref<3xf32, #tpu.memory_space<smem>>
    %9 = vector.broadcast %8 : f32 to vector<1x256xf32>
    %10 = arith.addf %7, %9 : vector<1x256xf32>
    %11 = vector.extract_strided_slice %2 {offsets = [2, 0], sizes = [1, 256], strides = [1, 1]} : vector<3x256xf32> to vector<1x256xf32>
    %c2 = arith.constant 2 : index
    %12 = memref.load %arg3[%c2] : memref<3xf32, #tpu.memory_space<smem>>
    %13 = vector.broadcast %12 : f32 to vector<1x256xf32>
    %14 = arith.addf %11, %13 : vector<1x256xf32>
    %15 = arith.maximumf %6, %10 : vector<1x256xf32>
    %16 = arith.maximumf %15, %14 : vector<1x256xf32>
    %17 = arith.subf %6, %16 : vector<1x256xf32>
    %18 = math.exp %17 : vector<1x256xf32>
    %19 = arith.subf %10, %16 : vector<1x256xf32>
    %20 = math.exp %19 : vector<1x256xf32>
    %21 = arith.subf %14, %16 : vector<1x256xf32>
    %22 = math.exp %21 : vector<1x256xf32>
    %23 = arith.addf %18, %20 : vector<1x256xf32>
    %24 = arith.addf %23, %22 : vector<1x256xf32>
    %cst_4 = arith.constant 1.000000e+00 : f32
    %25 = vector.broadcast %cst_4 : f32 to vector<1x256xf32>
    %26 = arith.divf %25, %24 : vector<1x256xf32>
    %27 = arith.mulf %18, %26 : vector<1x256xf32>
    %c0_5 = arith.constant 0 : index
    %c0_6 = arith.constant 0 : index
    %28 = vector.load %arg4[%c0_5, %c0_6] : memref<3x256xf32, #tpu.memory_space<vmem>>, vector<1x256xf32>
    tpu.vector_store %arg4[%c0_5, %c0_6], %27 {strides = array<i32>} : memref<3x256xf32, #tpu.memory_space<vmem>>, vector<1x256xf32>,
    %29 = arith.mulf %20, %26 : vector<1x256xf32>
    %c1_7 = arith.constant 1 : index
    %c0_8 = arith.constant 0 : index
    %30 = vector.load %arg4[%c1_7, %c0_8] : memref<3x256xf32, #tpu.memory_space<vmem>>, vector<1x256xf32>
    tpu.vector_store %arg4[%c1_7, %c0_8], %29 {strides = array<i32>} : memref<3x256xf32, #tpu.memory_space<vmem>>, vector<1x256xf32>,
    %31 = arith.mulf %22, %26 : vector<1x256xf32>
    %c2_9 = arith.constant 2 : index
    %c0_10 = arith.constant 0 : index
    %32 = vector.load %arg4[%c2_9, %c0_10] : memref<3x256xf32, #tpu.memory_space<vmem>>, vector<1x256xf32>
    tpu.vector_store %arg4[%c2_9, %c0_10], %31 {strides = array<i32>} : memref<3x256xf32, #tpu.memory_space<vmem>>, vector<1x256xf32>,
    return
  }
  func.func @transform_0(%arg0: i32) -> (i32, i32) {
    %c0_i32 = arith.constant 0 : i32
    %c0_i32_0 = arith.constant 0 : i32
    return %arg0, %c0_i32 : i32, i32
  }
  func.func @transform_1(%arg0: i32) -> (i32, i32) {
    %c0_i32 = arith.constant 0 : i32
    %c0_i32_0 = arith.constant 0 : i32
    %c0_i32_1 = arith.constant 0 : i32
    return %c0_i32, %c0_i32_0 : i32, i32
  }
  func.func @transform_2(%arg0: i32) -> i32 {
    %c0_i32 = arith.constant 0 : i32
    %c0_i32_0 = arith.constant 0 : i32
    return %c0_i32 : i32
  }
  func.func @transform_3(%arg0: i32) -> (i32, i32) {
    %c0_i32 = arith.constant 0 : i32
    %c0_i32_0 = arith.constant 0 : i32
    return %c0_i32, %arg0 : i32, i32
  }
}

</mosaic_0001>

<bundles_post_ra>
// kernel: tpu_custom_call.1
= control target key start
LH: loop header
LB: loop body
LE: loop exit
PB: predicated region body
PF: predicated region fallthrough
CT: control target
= control target key end

     0   :  { %8 = vsyncpa [#allocation3], 0  ;;  %s1027_s0 = inlined_call_operand.hbm [shape: f32[1024,128], index: 0, kind: input, shape index: {}]   ;;  %s1028_s1 = inlined_call_operand.hbm [shape: f32[3,128], index: 1, kind: input, shape index: {}]   ;;  %s1029_s2 = inlined_call_operand.vmem [shape: f32[3], index: 2, kind: input, shape index: {}]   ;;  %s1030_s3 = inlined_call_operand.hbm [shape: f32[3,1024], index: 3, kind: output, shape index: {}]  }
   0x1   :  { %10 = vsyncpa [#allocation3 + $0x1], 0 }
   0x2   :  { %11 = vsyncpa [#allocation7], 0 }
   0x3   :  { %12 = vsyncpa [#allocation5], 0 }
   0x4   :  { %13 = vsyncpa [#allocation4], 0 }
   0x5   :  { %15 = vsyncpa [#allocation4 + $0x1], 0  ;;  %s835_s12 = smov 0   ;;  %s837_s13 = smov 0  }
   0x6   :  { %s839_s14 = smov 0   ;;  %s841_s15 = smov 0  }
   0x7 LB: > { %s856_s16 = sadd.s32 4294967295, %s809_s15   ;;  %s551_s17 = sadd.s32 4294967294, %s809_s15   ;;  %s809_s15 = sphi %s841_s15, %s1042_s15   ;;  %s805_s14 = sphi %s839_s14, %s1041_s14   ;;  %s801_s13 = sphi %s837_s13, %s1040_s13   ;;  %s797_s12 = sphi %s835_s12, %s1039_s12  }
   0x8   : > { %s860_s18 = sadd.s32 1, %s809_s15   ;;  %s28_s19 = sadd.s32 1, %s805_s14 }
   0x9   : > { %s25_s20 = ssub.s32 %s809_s15, %s860_s18  ;;  %p35_p0 = scmp.ne.s32.totalorder %s805_s14, %s801_s13 }
   0xa   : > { %p26_p1 = scmp.eq.s32.totalorder %s25_s20, 0  ;;  %p36_p2 = scmp.eq.s32.totalorder %s809_s15, 0 }
   0xb   : > { %p41_p3 = scmp.ne.s32.totalorder %s801_s13, %s797_s12  ;;  %p42_p4 = scmp.eq.s32.totalorder %s856_s16, 0 }
   0xc   : > { %s872_s21 = scalar_select %p26_p1, %s805_s14, %s28_s19  }
   0xd   : > { %p874_p5 = por %p36_p2, %p35_p0  ;;  %p880_p6 = por %p42_p4, %p41_p3 }
   0xe   : > { %p107_p7 = scmp.eq.s32.totalorder %s856_s16, 3  ;;  %p113_p8 = scmp.eq.s32.totalorder %s551_s17, 3 }
   0xf   : > { %p552_p9 = scmp.ge.s32.totalorder %s809_s15, 1  ;;  %p120_p10 = scmp.lt.s32.totalorder %s809_s15, 5 }
  0x10   : > { %p887_p11 = por %p107_p7, %p35_p0  ;;  %p891_p12 = por %p113_p8, %p41_p3 }
  0x11   : > { %p895_p13 = pnand %p552_p9, %p120_p10  ;;  %s132_s29 = sshll.u32 %s1028_s1, 4  ;;  %s133_s29 = int_to_ptr.hbm [resolvable:$true] %s132_s29 }
  0x12   : > { %s811_s30 = smov [#allocation6]   ;;  %p604_p2 = scmp.lt.s32.totalorder %s809_s15, 4 }
  0x13   : > { %p587_p0 = pneg %p895_p13  ;;  %s134_s4 = sshll.u32 %s811_s30, 4  ;;  %s135_s4 = int_to_ptr.vmem [resolvable:$true] %s134_s4 }
  0x14   : > { %s144_s7 = sshll.u32 %s1029_s2, 4  ;;  %p912_p3 = pnand %p604_p2, %p874_p5  ;;  %s145_s7 = int_to_ptr.vmem [resolvable:$true] %s144_s7 }
  0x15   : > { %p588_p1 = pnand %p587_p0, %p42_p4  ;;  %s812_s9 = smov [#allocation8]  }
  0x16   : > { %s155_s10 = sand.u32 1, %s805_s14   ;;  %s573_s17 = sshll.u32 %s809_s15, 8 }
  0x17   : > { %590 = dma.hbm_to_vmem [thread:$0]  (!%p588_p1), %s133_s29, 64, %s135_s4, [#allocation7]  }
  0x18   : > { %593 = dma.vmem_to_smem (!%p588_p1), %s145_s7, 16, %s812_s9, [#allocation5]  }
  0x19   : > { %s556_s11 = sshll.u32 %s155_s10, 8  ;;  %s164_s27 = scalar_lea.hbm %s1027_s0, %s573_s17 }
  0x1a   : > { %s159_s28 = scalar_lea.vmem [#allocation2], %s556_s11  ;;  %s165_s5 = sshll.u32 %s164_s27, 4  ;;  %s166_s5 = int_to_ptr.hbm [resolvable:$true] %s165_s5 }
  0x1b   : > { %s167_s30 = sshll.u32 %s159_s28, 4  ;;  %s156_s22 = scalar_lea.sflag [#allocation3], %s155_s10  ;;  %s168_s30 = int_to_ptr.vmem [resolvable:$true] %s167_s30 }
  0x1c   : > { %s705_s29 = sshra.s32 %s166_s5, 4  ;;  %p709_p7 = pneg %p912_p3  ;;  %s706_s29 = int_to_ptr.hbm [resolvable:$true] %s705_s29 }
  0x1d   : > { %s707_s4 = scalar_lea.hbm %s706_s29, 256  ;;  %s712_s9 = scalar_lea.hbm %s1027_s0, 1024 }
  0x1e   : > { %p708_p5 = scmp.ne.s32.totalorder %s706_s29, %s707_s4  ;;  %p713_p10 = scmp.lt.s32.totalorder %s706_s29, %s1027_s0 }
  0x1f   : > { %p714_p0 = scmp.lt.s32.totalorder %s712_s9, %s707_s4 }
  0x20   : > { %p710_p8 = pnand %p709_p7, %p708_p5 }
  0x21   : > { %p715_p1 = por %p714_p0, %p713_p10 }
  0x22   : > { %p711_p9 = pneg %p710_p8 }
  0x24   : > { %p716_p2 = pnand %p715_p1, %p711_p9 }
  0x26   : > { %719 = shalt.err (!%p716_p2)
}
  0x27   : > { %s813_s10 = smov 128   ;;  %s814_s11 = smov 8  }
  0x28   : > { %597 = dma.hbm_to_vmem [thread:$0]  (!%p912_p3), %s166_s5, 4096, %s168_s30, %s156_s22, %s813_s10, %s813_s10, %s814_s11  }
  0x29   : > { %179 = sbr.rel (%p895_p13) target bundleno = 314 (0x13a), region = 32  ;;  %s934_s20 = sand.u32 (!%p895_p13), 1, %s801_s13  }
  0x2a   : > { %s560_s27 = sshll.u32 (!%p895_p13), %s934_s20, 8  ;;  %s182_s28 = scalar_lea.sflag (!%p895_p13), [#allocation3], %s934_s20 }
  0x2b   : > { %s938_s29 = scalar_lea.vmem (!%p895_p13), [#allocation2], %s560_s27 }
  0x2e   : > { %780 = dma.done.wait (%p880_p6), %s182_s28, 4096  }
  0x2f   : > { %782 = vsyncadd (%p880_p6), %s182_s28, 4294963200 }
  0x30   : > { %784 = dma.done.wait (%p42_p4), [#allocation7], 64  }
  0x31   : > { %786 = vsyncadd (%p42_p4), [#allocation7], 4294967232 }
  0x32   : > { %788 = dma.done.wait (%p42_p4), [#allocation5], 16  }
  0x33   : > { %790 = vsyncadd (%p42_p4), [#allocation5], 4294967280 }
  0x34   : > { %201 = sfence }
  0x35   : > { %v237_v0 = vld [vmem:[%s938_s29 + $0x78] sm:$0xff]  ;;  %v236_v2 = vld [vmem:[%s938_s29 + $0x70] sm:$0xff]  ;;  %v235_v4 = vld [vmem:[%s938_s29 + $0x68] sm:$0xff]  ;;  %s564_s23 = sld [smem:[#allocation8 + $0x1]]  ;;  %s563_s30 = sshll.u32 %s934_s20, 3  ;;  %vm402_vm8 = vcmask 1040384  }
  0x36   : > { %v253_v1 = vld [vmem:[%s938_s29 + $0xf8] sm:$0xff]  ;;  %255 = vmatpush.xpose.msra.mxu0 %v237_v0  ;;  %v252_v3 = vld [vmem:[%s938_s29 + $0xf0] sm:$0xff]  ;;  %v251_v5 = vld [vmem:[%s938_s29 + $0xe8] sm:$0xff]  ;;  %s565_s26 = sld [smem:[#allocation8 + $0x2]]  ;;  %s219_s5 = scalar_lea.vmem [#allocation9], %s563_s30 }
  0x37   : > { %275 = vmatpush.xpose.msra.mxu1 %v253_v1  ;;  %v234_v6 = vld [vmem:[%s938_s29 + $0x60] sm:$0xff]  ;;  %v233_v8 = vld [vmem:[%s938_s29 + $0x58] sm:$0xff]  ;;  %v232_v10 = vld [vmem:[%s938_s29 + $0x50] sm:$0xff]  ;;  %s295_s8 = sld [smem:[#allocation8]]  ;;  %s574_s22 = sshll.u32 %s856_s16, 3 }
  0x38   : > { %v250_v7 = vld [vmem:[%s938_s29 + $0xe0] sm:$0xff]  ;;  %v249_v9 = vld [vmem:[%s938_s29 + $0xd8] sm:$0xff]  ;;  %v248_v11 = vld [vmem:[%s938_s29 + $0xd0] sm:$0xff]  ;;  %s454_s7 = scalar_lea.hbm %s1030_s3, %s574_s22  ;;  %s456_s9 = sshll.u32 %s219_s5, 4  ;;  %s457_s9 = int_to_ptr.vmem [resolvable:$true] %s456_s9 }
  0x39   : > { %v231_v12 = vld [vmem:[%s938_s29 + $0x48] sm:$0xff]  ;;  %v230_v14 = vld [vmem:[%s938_s29 + $0x40] sm:$0xff]  ;;  %v229_v16 = vld [vmem:[%s938_s29 + $0x38] sm:$0xff]  ;;  %s458_s19 = sshll.u32 %s454_s7, 4  ;;  %s443_s16 = scalar_lea.sflag [#allocation4], %s934_s20  ;;  %s459_s19 = int_to_ptr.hbm [resolvable:$true] %s458_s19 }
  0x3a   : > { %256 = vmatpush.xpose.msra.mxu0 %v236_v2  ;;  %v247_v13 = vld [vmem:[%s938_s29 + $0xc8] sm:$0xff]  ;;  %v246_v15 = vld [vmem:[%s938_s29 + $0xc0] sm:$0xff]  ;;  %v245_v17 = vld [vmem:[%s938_s29 + $0xb8] sm:$0xff]  ;;  %s749_s17 = sshra.s32 %s459_s19, 4  ;;  %s755_s28 = scalar_lea.hbm %s1030_s3, 32  ;;  %s750_s17 = int_to_ptr.hbm [resolvable:$true] %s749_s17 }
  0x3b   : > { %276 = vmatpush.xpose.msra.mxu1 %v252_v3  ;;  %v228_v18 = vld [vmem:[%s938_s29 + $0x30] sm:$0xff]  ;;  %v227_v20 = vld [vmem:[%s938_s29 + $0x28] sm:$0xff]  ;;  %v226_v22 = vld [vmem:[%s938_s29 + $0x20] sm:$0xff]  ;;  %v300_v33 = vstv %s564_s23  ;;  %s751_s10 = scalar_lea.hbm %s750_s17, 8  ;;  %p756_p3 = scmp.lt.s32.totalorder %s750_s17, %s1030_s3 }
  0x3c   : > { %v244_v19 = vld [vmem:[%s938_s29 + $0xb0] sm:$0xff]  ;;  %v243_v21 = vld [vmem:[%s938_s29 + $0xa8] sm:$0xff]  ;;  %v242_v23 = vld [vmem:[%s938_s29 + $0xa0] sm:$0xff]  ;;  %v304_v34 = vstv %s565_s26  ;;  %p752_p4 = scmp.ne.s32.totalorder %s750_s17, %s751_s10  ;;  %p757_p5 = scmp.lt.s32.totalorder %s755_s28, %s751_s10 }
  0x3d   : > { %v225_v24 = vld [vmem:[%s938_s29 + $0x18] sm:$0xff]  ;;  %v224_v26 = vld [vmem:[%s938_s29 + $0x10] sm:$0xff]  ;;  %v223_v28 = vld [vmem:[%s938_s29 + $0x8] sm:$0xff]  ;;  %v296_v36 = vstv %s295_s8 }
  0x3e   : > { %257 = vmatpush.xpose.msra.mxu0 %v235_v4  ;;  %v241_v25 = vld [vmem:[%s938_s29 + $0x98] sm:$0xff]  ;;  %v240_v27 = vld [vmem:[%s938_s29 + $0x90] sm:$0xff]  ;;  %v239_v29 = vld [vmem:[%s938_s29 + $0x88] sm:$0xff]  ;;  %p753_p6 = pnand %p752_p4, %p887_p11  ;;  %p758_p7 = por %p757_p5, %p756_p3 }
  0x3f   : > { %277 = vmatpush.xpose.msra.mxu1 %v251_v5  ;;  %v222_v30 = vld [vmem:[%s938_s29] sm:$0xff] }
  0x40   : > { %v238_v31 = vld [vmem:[%s938_s29 + $0x80] sm:$0xff]  ;;  %p754_p13 = pneg %p753_p6 }
  0x41   : > { %v254_v32 = vld [vmem:[#allocation6] sm:$0x7] }
  0x42   : > { %258 = vmatpush.xpose.msra.mxu0 %v234_v6  ;;  %p759_p8 = pnand %p758_p7, %p754_p13 }
  0x43   : > { %278 = vmatpush.xpose.msra.mxu1 %v250_v7 }
  0x46   : > { %259 = vmatpush.xpose.msra.mxu0 %v233_v8 }
  0x47   : > { %279 = vmatpush.xpose.msra.mxu1 %v249_v9 }
  0x4a   : > { %260 = vmatpush.xpose.msra.mxu0 %v232_v10 }
  0x4b   : > { %280 = vmatpush.xpose.msra.mxu1 %v248_v11 }
  0x4e   : > { %261 = vmatpush.xpose.msra.mxu0 %v231_v12 }
  0x4f   : > { %281 = vmatpush.xpose.msra.mxu1 %v247_v13 }
  0x52   : > { %262 = vmatpush.xpose.msra.mxu0 %v230_v14 }
  0x53   : > { %282 = vmatpush.xpose.msra.mxu1 %v246_v15 }
  0x56   : > { %263 = vmatpush.xpose.msra.mxu0 %v229_v16 }
  0x57   : > { %283 = vmatpush.xpose.msra.mxu1 %v245_v17 }
  0x5a   : > { %264 = vmatpush.xpose.msra.mxu0 %v228_v18 }
  0x5b   : > { %284 = vmatpush.xpose.msra.mxu1 %v244_v19 }
  0x5e   : > { %265 = vmatpush.xpose.msra.mxu0 %v227_v20 }
  0x5f   : > { %285 = vmatpush.xpose.msra.mxu1 %v243_v21 }
  0x62   : > { %266 = vmatpush.xpose.msra.mxu0 %v226_v22 }
  0x63   : > { %286 = vmatpush.xpose.msra.mxu1 %v242_v23 }
  0x66   : > { %267 = vmatpush.xpose.msra.mxu0 %v225_v24 }
  0x67   : > { %287 = vmatpush.xpose.msra.mxu1 %v241_v25 }
  0x6a   : > { %268 = vmatpush.xpose.msra.mxu0 %v224_v26 }
  0x6b   : > { %288 = vmatpush.xpose.msra.mxu1 %v240_v27 }
  0x6e   : > { %269 = vmatpush.xpose.msra.mxu0 %v223_v28 }
  0x6f   : > { %289 = vmatpush.xpose.msra.mxu1 %v239_v29 }
  0x72   : > { %270 = vmatpush.xpose.msra.mxu0 %v222_v30 }
  0x73   : > { %290 = vmatpush.xpose.msra.mxu1 %v238_v31 }
  0x75   : > { %271 = vmatmul.f32.vlgmr.msra.gmra.mxu0 %v254_v32 }
  0x76   : > { %291 = vmatmul.f32.vlgmr.msra.gmra.mxu1 %v254_v32 }
  0xf2   : > { %v272_v35 = vpop.f32.mrf.mxu0 }
  0xf3   : > { %v292_v37 = vpop.f32.mrf.mxu1  ;;  %v301_v38 = vadd.f32 %v300_v33, %v272_v35  ;;  %v305_v39 = vadd.f32 %v304_v34, %v272_v35  ;;  %v297_v42 = vadd.f32 %v296_v36, %v272_v35 }
  0xf4   : > { %v302_v40 = vadd.f32 %v300_v33, %v292_v37  ;;  %v306_v41 = vadd.f32 %v304_v34, %v292_v37  ;;  %v298_v44 = vadd.f32 %v296_v36, %v292_v37 }
  0xf5   : > { %v309_v43 = vrot.slane %v301_v38, 1  ;;  %v317_v47 = vrot.slane %v305_v39, 2 }
  0xf6   : > { %v310_v45 = vrot.slane %v302_v40, 1  ;;  %v318_v49 = vrot.slane %v306_v41, 2 }
  0xf7   : > { %v313_v46 = vmax.f32 %v297_v42, %v309_v43 }
  0xf8   : > { %v314_v48 = vmax.f32 %v298_v44, %v310_v45 }
  0xf9   : > { %v321_v50 = vmax.f32 %v313_v46, %v317_v47 }
  0xfa   : > { %v322_v51 = vmax.f32 %v314_v48, %v318_v49 }
  0xfb   : > { %v323_v52 = vsub.f32 %v297_v42, %v321_v50  ;;  %v331_v53 = vrot.slane %v321_v50, 7  ;;  %v341_v54 = vrot.slane %v321_v50, 6 }
  0xfc   : > { %v332_v55 = vrot.slane %v322_v51, 7  ;;  %v342_v56 = vrot.slane %v322_v51, 6  ;;  %v324_v60 = vsub.f32 %v298_v44, %v322_v51 }
  0xfd   : > { %v325_v57 = vmul.f32 1.442695, %v323_v52  ;;  %v335_v58 = vsub.f32 %v301_v38, %v331_v53  ;;  %v345_v59 = vsub.f32 %v305_v39, %v341_v54  ;;  %v405_v38 = vlaneseq }
  0xfe   : > { %v336_v61 = vsub.f32 %v302_v40, %v332_v55  ;;  %v346_v62 = vsub.f32 %v306_v41, %v342_v56  ;;  %v327_v3 = vmul.f32 1.442695, %v324_v60 }
  0xff   : > { %v337_v63 = vmul.f32 1.442695, %v335_v58  ;;  %v347_v0 = vmul.f32 1.442695, %v345_v59  ;;  %644 = vpow2.f32 %v325_v57  ;;  %vm985_vm9 = vcmp.lt.s32.totalorder %v405_v38, 256 }
 0x100   : > { %v339_v1 = vmul.f32 1.442695, %v336_v61  ;;  %v349_v2 = vmul.f32 1.442695, %v346_v62 }
 0x101   : > { %646 = vpow2.f32 %v337_v63 }
 0x102   : > { %648 = vpow2.f32 %v347_v0 }
 0x103   : > { %650 = vpow2.f32 %v339_v1 }
 0x104   : > { %652 = vpow2.f32 %v349_v2 }
 0x105   : > { %654 = vpow2.f32 %v327_v3  ;;  %v645_v4 = vpop.eup %644 }
 0x107   : > { %v647_v5 = vpop.eup %646 }
 0x108   : > { %v649_v6 = vpop.eup %648  ;;  %v353_v7 = vrot.slane %v647_v5, 1 }
 0x109   : > { %v651_v8 = vpop.eup %650  ;;  %v361_v11 = vrot.slane %v649_v6, 2 }
 0x10a   : > { %v653_v9 = vpop.eup %652  ;;  %v357_v10 = vadd.f32 %v645_v4, %v353_v7  ;;  %v354_v12 = vrot.slane %v651_v8, 1 }
 0x10b   : > { %v655_v13 = vpop.eup %654  ;;  %v362_v16 = vrot.slane %v653_v9, 2 }
 0x10c   : > { %v365_v14 = vadd.f32 %v361_v11, %v357_v10  ;;  %v358_v15 = vadd.f32 %v655_v13, %v354_v12 }
 0x10e   : > { %656 = vrcp.f32 %v365_v14  ;;  %v366_v17 = vadd.f32 %v362_v16, %v358_v15  ;;  %v378_v22 = vand.u32 2147483648, %v365_v14  ;;  %v376_v25 = vand.u32 2147483647, %v365_v14 }
 0x10f   : > { %vm372_vm1 = vweird.f32 %v365_v14 }
 0x110   : > { %658 = vrcp.f32 %v366_v17  ;;  %v393_v28 = vand.u32 2147483648, %v366_v17  ;;  %v379_v29 = vor.u32 1.1754944e-38, %v378_v22  ;;  %v391_v31 = vand.u32 2147483647, %v366_v17 }
 0x111   : > { %vm377_vm4 = vcmp.eq.f32.partialorder %v376_v25, 8.507059e+37  ;;  %vm387_vm5 = vweird.f32 %v366_v17 }
 0x112   : > { %v394_v36 = vor.u32 1.1754944e-38, %v393_v28  ;;  %vm392_vm7 = vcmp.eq.f32.partialorder %v391_v31, 8.507059e+37 }
 0x114   : > { %v657_v18 = vpop.eup %656 }
 0x115   : > { %v368_v19 = vmul.f32 %v657_v18, %v365_v14  ;;  %vm373_vm0 = vweird.f32 %v657_v18 }
 0x116   : > { %v659_v20 = vpop.eup %658  ;;  %vm374_vm2 = vmor %vm372_vm1, %vm373_vm0 }
 0x117   : > { %v369_v21 = vsub.f32 1.0, %v368_v19  ;;  %v383_v23 = vmul.f32 %v659_v20, %v366_v17  ;;  %vm388_vm3 = vweird.f32 %v659_v20 }
 0x118   : > { %vm389_vm6 = vmor %vm387_vm5, %vm388_vm3 }
 0x119   : > { %v370_v24 = vmul.f32 %v657_v18, %v369_v21  ;;  %v384_v26 = vsub.f32 1.0, %v383_v23 }
 0x11b   : > { %v371_v27 = vadd.f32 %v657_v18, %v370_v24  ;;  %v385_v30 = vmul.f32 %v659_v20, %v384_v26 }
 0x11d   : > { %v375_v32 = vsel %vm374_vm2, %v657_v18, %v371_v27  ;;  %v386_v34 = vadd.f32 %v659_v20, %v385_v30 }
 0x11e   : > { %v380_v33 = vsel %vm377_vm4, %v379_v29, %v375_v32 }
 0x11f   : > { %v412_v35 = vrot.slane %v380_v33, 7  ;;  %v390_v37 = vsel %vm389_vm6, %v659_v20, %v386_v34  ;;  %v397_v43 = vmul.f32 %v645_v4, %v380_v33  ;;  %v427_v48 = vrot.slane %v380_v33, 6 }
 0x120   : > { %v395_v40 = vsel %vm392_vm7, %v394_v36, %v390_v37 }
 0x121   : > { %v416_v39 = vmul.f32 %v647_v5, %v412_v35  ;;  %v398_v41 = vmul.f32 %v655_v13, %v395_v40  ;;  %v413_v42 = vrot.slane %v395_v40, 7  ;;  %v428_v49 = vrot.slane %v395_v40, 6 }
 0x122   : > { %v431_v50 = vmul.f32 %v649_v6, %v427_v48 }
 0x123   : > { %420 = vst [vmem:[#allocation1] sm:$0xff] %v416_v39  ;;  %v401_v44 = vrot.slane %v398_v41, 7  ;;  %v417_v45 = vmul.f32 %v651_v8, %v413_v42  ;;  %v432_v52 = vmul.f32 %v653_v9, %v428_v49 }
 0x125   : > { %421 = vst [vmem:[#allocation1 + $0x9] sm:$0xff] %v417_v45  ;;  %v403_v47 = vsel %vm402_vm8, %v397_v43, %v401_v44 }
 0x126   : > { %409 = vst.msk [vmem:[%s219_s5] ss:$4 sm:$0x3] %vm985_vm9, %v403_v47 }
 0x12c   : > { %v423_v51 = vld [vmem:[#allocation1 + $0x1] ss:$9 sm:$0xff] }
 0x12d   : > { %566 = vst.msk [vmem:[%s219_s5 + $0x1] ss:$4 sm:$0x3] %vm985_vm9, %v423_v51 }
 0x12e   : > { %435 = vst [vmem:[#allocation1] sm:$0xff] %v431_v50 }
 0x12f   : > { %436 = vst [vmem:[#allocation1 + $0x9] sm:$0xff] %v432_v52 }
 0x136   : > { %v438_v53 = vld [vmem:[#allocation1 + $0x2] ss:$9 sm:$0xff] }
 0x137   : > { %567 = vst.msk [vmem:[%s219_s5 + $0x2] ss:$4 sm:$0x3] %vm985_vm9, %v438_v53 }
 0x138   : > { %762 = shalt.err (!%p759_p8)
}
 0x139   : > { %585 = dma.vmem_to_hbm [thread:$0]  (%p887_p11), %s457_s9, 128, %s459_s19, %s443_s16  }
 0x13a PF: > { %p607_p9 = scmp.ge.s32.totalorder %s809_s15, 2  ;;  %s470_s20 = sand.u32 1, %s797_s12  }
 0x13b   : > { %s471_s26 = scalar_lea.sflag [#allocation4], %s470_s20 }
 0x13c   : > { %p599_p10 = pnand %p607_p9, %p891_p12 }
 0x13e   : > { %p600_p0 = pneg %p599_p10 }
 0x140   : > { %792 = dma.done.wait (%p600_p0), %s471_s26, 128  }
 0x141   : > { %794 = vsyncadd (%p600_p0), %s471_s26, 4294967168  ;;  %p18_p1 = scmp.ge.s32.totalorder %s860_s18, 6   ;;  %s1039_s12 = smov %s801_s13 }
 0x142   : > { %s1040_s13 = smov %s805_s14  ;;  %s1041_s14 = smov %s872_s21 }
 0x143   : > { %s1042_s15 = smov %s860_s18  ;;  %20 = sbr.rel (!%p18_p1) target bundleno = 7 (0x7), region = 90 }
 0x148   :  { %477 = vsyncpa [#allocation3], 1 }
 0x149   :  { %479 = vsyncpa [#allocation3 + $0x1], 1 }
 0x14a   :  { %480 = vsyncpa [#allocation7], 1 }
 0x14b   :  { %481 = vsyncpa [#allocation4], 1 }
 0x14c   :  { %483 = vsyncpa [#allocation4 + $0x1], 1 }
 0x14d   :  { %484 = vsyncpa [#allocation5], 1 }
 0x14e   :  { %486 = vsyncpa [#allocation5 + $0x1], 1 }

</bundles_post_ra>
